<compile_context>
chip_gen: v6e
topology: v6e:2x2x1
jax: 0.10.0
libtpu: 0.0.40
codegen_flags: <defaults>
</compile_context>

<pallas_src>
import functools

import jax
import jax.numpy as jnp
from jax.experimental import pallas as pl
from jax.experimental.pallas import tpu as pltpu


def _round_up(x: int, m: int) -> int:
    return (x + m - 1) // m * m


def _mlp_decoder_kernel(z_ref, w1_ref, b1_ref, w2_ref, b2_ref, o_ref):
    # Layer 1: tiny (block_b, z_dim) @ (z_dim, hidden) matmul; recomputed per N step
    # (negligible vs. layer 2). Inputs are already bf16; accumulate in f32.
    h = jnp.dot(z_ref[...], w1_ref[...], preferred_element_type=jnp.float32)
    h = jnp.maximum(h + b1_ref[...], 0.0)                       # bias + nn.ReLU() in f32
    # Layer 2: (block_b, hidden) @ (hidden, block_n) on the MXU, f32 accumulation.
    y = jnp.dot(h.astype(w2_ref.dtype), w2_ref[...],
                preferred_element_type=jnp.float32) + b2_ref[...]
    o_ref[...] = y.astype(o_ref.dtype)


def choose_tiling(B, hidden_dim, x_dim, *, max_block_b=512,
                  resident_n_limit=2048, max_block_n=2048):
    """Pick (block_b, b_pad, block_n, x_pad) once, outside the hot path."""
    block_b = _round_up(min(max_block_b, _round_up(B, 16)), 16)
    b_pad = _round_up(B, block_b)
    grid_b = b_pad // block_b

    x_pad = _round_up(x_dim, 128)
    if x_pad <= resident_n_limit:
        if grid_b >= 2 or x_pad < 256 or x_pad % 256 != 0:
            block_n = x_pad                 # W2/b2 fully resident, single N step
        else:
            block_n = x_pad // 2            # 2 parallel N steps -> both v7x TCs busy
    else:
        block_n = max_block_n               # large x_dim: tile N, W2 DMA'd once per tile
        x_pad = _round_up(x_pad, block_n)
    return block_b, b_pad, block_n, x_pad


def prepare_decoder_params(w1, b1, w2, b2, *, x_pad, use_bf16=True):
    """One-time pad + cast of the weights (do NOT call this per forward pass)."""
    w_dtype = jnp.bfloat16 if use_bf16 else jnp.float32
    x_dim = w2.shape[1]
    if x_pad != x_dim:
        w2 = jnp.pad(w2, ((0, 0), (0, x_pad - x_dim)))
        b2 = jnp.pad(b2, ((0, 0), (0, x_pad - x_dim)))
    return (w1.astype(w_dtype), b1.astype(jnp.float32),
            w2.astype(w_dtype), b2.astype(jnp.float32))


@functools.partial(jax.jit,
                   static_argnames=("x_dim", "block_b", "block_n", "out_dtype"))
def variational_decoder(z, w1, b1, w2, b2, *, x_dim, block_b, block_n,
                        out_dtype=jnp.float32):
    """Forward pass of VariationalDecoder.

    z:  (B, z_dim)            float32 (cast to the weight dtype inside)
    w1: (z_dim, hidden_dim)   bf16/f32  (prepared: torch weight transposed)
    b1: (1, hidden_dim)       f32
    w2: (hidden_dim, x_pad)   bf16/f32  (prepared: padded to x_pad)
    b2: (1, x_pad)            f32
    returns (B, x_dim) out_dtype
    """
    B, z_dim = z.shape
    hidden_dim = w1.shape[1]
    x_pad = w2.shape[1]
    assert x_pad % block_n == 0 and x_pad >= x_dim

    b_pad = _round_up(B, block_b)
    zc = z.astype(w1.dtype)                       # single cheap cast of the tiny activation
    if b_pad != B:
        zc = jnp.pad(zc, ((0, b_pad - B), (0, 0)))

    grid_b = b_pad // block_b
    grid_n = x_pad // block_n
    w_bytes = jnp.dtype(w1.dtype).itemsize
    o_bytes = jnp.dtype(out_dtype).itemsize

    # Honest DMA traffic for the (N outer, batch inner) grid order:
    #   W1/b1 and each W2/b2 tile fetched once; z refetched once per N step.
    cost = pl.CostEstimate(
        flops=2 * b_pad * (z_dim * hidden_dim * grid_n + hidden_dim * x_pad),
        transcendentals=0,
        bytes_accessed=(grid_n * b_pad * z_dim * w_bytes
                        + z_dim * hidden_dim * w_bytes + hidden_dim * 4
                        + hidden_dim * x_pad * w_bytes + x_pad * 4
                        + b_pad * x_pad * o_bytes),
    )

    out = pl.pallas_call(
        _mlp_decoder_kernel,
        out_shape=jax.ShapeDtypeStruct((b_pad, x_pad), out_dtype),
        grid_spec=pltpu.PrefetchScalarGridSpec(
            num_scalar_prefetch=0,
            grid=(grid_n, grid_b),                                # N outer, batch inner
            in_specs=[
                pl.BlockSpec((block_b, z_dim), lambda j, i: (i, 0)),       # z tile
                pl.BlockSpec((z_dim, hidden_dim), lambda j, i: (0, 0)),    # W1 (resident)
                pl.BlockSpec((1, hidden_dim), lambda j, i: (0, 0)),        # b1 (resident)
                pl.BlockSpec((hidden_dim, block_n), lambda j, i: (0, j)),  # W2 N-tile
                pl.BlockSpec((1, block_n), lambda j, i: (0, j)),           # b2 N-tile
            ],
            out_specs=pl.BlockSpec((block_b, block_n), lambda j, i: (i, j)),
        ),
        compiler_params=pltpu.CompilerParams(
            dimension_semantics=("parallel", "parallel")),
        cost_estimate=cost,
    )(zc, w1, b1, w2, b2)

    return out[:B, :x_dim]


def init_params(key, z_dim, hidden_dim, x_dim, dtype=jnp.float32):
    """Deterministic torch-Linear-style init (uniform(-1/sqrt(fan_in), +))."""
    k1, k2, k3, k4 = jax.random.split(key, 4)
    lim1 = 1.0 / jnp.sqrt(z_dim)
    lim2 = 1.0 / jnp.sqrt(hidden_dim)
    w1 = jax.random.uniform(k1, (z_dim, hidden_dim), dtype, -lim1, lim1)
    b1 = jax.random.uniform(k2, (1, hidden_dim), dtype, -lim1, lim1)
    w2 = jax.random.uniform(k3, (hidden_dim, x_dim), dtype, -lim2, lim2)
    b2 = jax.random.uniform(k4, (1, x_dim), dtype, -lim2, lim2)
    return w1, b1, w2, b2


def reference_forward_f32(z, w1, b1, w2, b2):
    h = jnp.maximum(z @ w1 + b1, 0.0)
    return h @ w2 + b2


def reference_forward_bf16(z, w1, b1, w2, b2):
    # Same dtype strategy as the kernel (bf16 MXU inputs, f32 accumulation).
    h = jnp.dot(z.astype(jnp.bfloat16), w1.astype(jnp.bfloat16),
                preferred_element_type=jnp.float32) + b1
    h = jnp.maximum(h, 0.0)
    return jnp.dot(h.astype(jnp.bfloat16), w2.astype(jnp.bfloat16),
                   preferred_element_type=jnp.float32) + b2


if __name__ == "__main__":
    # Module defaults: z_dim=8, hidden_dim=128, x_dim=1000 (n_hidden=0, res_connect=False).
    # B=12 exercises batch padding; x_dim=1000 exercises lane padding to 1024; the
    # grid_b==1 case exercises the 2-way N split (both v7x TensorCores get a step).
    B, Z_DIM, HIDDEN_DIM, X_DIM = 12, 8, 128, 1000

    key = jax.random.PRNGKey(0)
    kz, kp = jax.random.split(key)
    z = jax.random.normal(kz, (B, Z_DIM), jnp.float32)
    w1, b1, w2, b2 = init_params(kp, Z_DIM, HIDDEN_DIM, X_DIM)

    # One-time tiling choice + weight pad/cast (hoisted out of the per-call path).
    block_b, b_pad, block_n, x_pad = choose_tiling(B, HIDDEN_DIM, X_DIM)
    params = prepare_decoder_params(w1, b1, w2, b2, x_pad=x_pad, use_bf16=True)

    out = variational_decoder(z, *params, x_dim=X_DIM,
                              block_b=block_b, block_n=block_n)
    out = jax.block_until_ready(out)
    assert out.shape == (B, X_DIM)

    ref_bf = reference_forward_bf16(z, w1, b1, w2, b2)
    ref_32 = reference_forward_f32(z, w1, b1, w2, b2)
    assert jnp.allclose(out, ref_bf, atol=2e-3, rtol=2e-3), "mismatch vs bf16-matmul reference"
    assert jnp.allclose(out, ref_32, atol=5e-2, rtol=5e-2), "mismatch vs f32 reference"

    # TODO(synk): n_hidden > 0 / res_connect=True variants of MultiLayerPerceptron would add
    # a loop of resident hidden-layer matmuls (plus residual adds) inside the kernel.
    print("KERNEL_OK")
</pallas_src>

<mosaic_0001>
module attributes {stable_mosaic.version = 11 : i64} {
  func.func @_mlp_decoder_kernel(%arg0: i32, %arg1: i32, %arg2: memref<16x8xbf16, #tpu.memory_space<vmem>>, %arg3: memref<8x128xbf16, #tpu.memory_space<vmem>>, %arg4: memref<1x128xf32, #tpu.memory_space<vmem>>, %arg5: memref<128x512xbf16, #tpu.memory_space<vmem>>, %arg6: memref<1x512xf32, #tpu.memory_space<vmem>>, %arg7: memref<16x512xf32, #tpu.memory_space<vmem>>) attributes {dimension_semantics = [#tpu.dimension_semantics<parallel>, #tpu.dimension_semantics<parallel>], iteration_bounds = array<i64: 2, 1>, scalar_prefetch = 0 : i64, scratch_operands = 0 : i64, tpu.core_type = #tpu.core_type<tc>, window_params = [{transform_indices = @transform_0, window_bounds = array<i64: 16, 8>}, {pipeline_mode = #tpu.pipeline_mode<synchronous>, transform_indices = @transform_1, window_bounds = array<i64: 8, 128>}, {pipeline_mode = #tpu.pipeline_mode<synchronous>, transform_indices = @transform_2, window_bounds = array<i64: 1, 128>}, {transform_indices = @transform_3, window_bounds = array<i64: 128, 512>}, {transform_indices = @transform_4, window_bounds = array<i64: 1, 512>}, {transform_indices = @transform_5, window_bounds = array<i64: 16, 512>}]} {
    %c0 = arith.constant 0 : index
    %c0_0 = arith.constant 0 : index
    %0 = vector.load %arg2[%c0, %c0_0] : memref<16x8xbf16, #tpu.memory_space<vmem>>, vector<16x8xbf16>
    %c0_1 = arith.constant 0 : index
    %c0_2 = arith.constant 0 : index
    %1 = vector.load %arg3[%c0_1, %c0_2] : memref<8x128xbf16, #tpu.memory_space<vmem>>, vector<8x128xbf16>
    %cst = arith.constant dense<0.000000e+00> : vector<16x128xf32>
    %2 = tpu.matmul %0, %1, %cst {dimension_numbers = #tpu.dot_dimension_numbers<[1], [0], [0], [1], [0, 0, 1, 1], [], []>} : vector<16x8xbf16>, vector<8x128xbf16>, vector<16x128xf32> -> vector<16x128xf32>
    %c0_3 = arith.constant 0 : index
    %c0_4 = arith.constant 0 : index
    %3 = vector.load %arg4[%c0_3, %c0_4] : memref<1x128xf32, #tpu.memory_space<vmem>>, vector<1x128xf32>
    %4 = vector.broadcast %3 : vector<1x128xf32> to vector<16x128xf32>
    %5 = arith.addf %2, %4 : vector<16x128xf32>
    %cst_5 = arith.constant 0.000000e+00 : f32
    %6 = vector.broadcast %cst_5 : f32 to vector<16x128xf32>
    %7 = arith.maximumf %5, %6 : vector<16x128xf32>
    %8 = arith.truncf %7 : vector<16x128xf32> to vector<16x128xbf16>
    %c0_6 = arith.constant 0 : index
    %c0_7 = arith.constant 0 : index
    %9 = vector.load %arg5[%c0_6, %c0_7] : memref<128x512xbf16, #tpu.memory_space<vmem>>, vector<128x512xbf16>
    %cst_8 = arith.constant dense<0.000000e+00> : vector<16x512xf32>
    %10 = tpu.matmul %8, %9, %cst_8 {dimension_numbers = #tpu.dot_dimension_numbers<[1], [0], [0], [1], [0, 0, 1, 1], [], []>} : vector<16x128xbf16>, vector<128x512xbf16>, vector<16x512xf32> -> vector<16x512xf32>
    %c0_9 = arith.constant 0 : index
    %c0_10 = arith.constant 0 : index
    %11 = vector.load %arg6[%c0_9, %c0_10] : memref<1x512xf32, #tpu.memory_space<vmem>>, vector<1x512xf32>
    %12 = vector.broadcast %11 : vector<1x512xf32> to vector<16x512xf32>
    %13 = arith.addf %10, %12 : vector<16x512xf32>
    %c0_11 = arith.constant 0 : index
    %c0_12 = arith.constant 0 : index
    %14 = vector.load %arg7[%c0_11, %c0_12] : memref<16x512xf32, #tpu.memory_space<vmem>>, vector<16x512xf32>
    tpu.vector_store %arg7[%c0_11, %c0_12], %13 {strides = array<i32>} : memref<16x512xf32, #tpu.memory_space<vmem>>, vector<16x512xf32>,
    return
  }
  func.func @transform_0(%arg0: i32, %arg1: i32) -> (i32, i32) {
    %c0_i32 = arith.constant 0 : i32
    %c0_i32_0 = arith.constant 0 : i32
    return %arg1, %c0_i32 : i32, i32
  }
  func.func @transform_1(%arg0: i32, %arg1: i32) -> (i32, i32) {
    %c0_i32 = arith.constant 0 : i32
    %c0_i32_0 = arith.constant 0 : i32
    %c0_i32_1 = arith.constant 0 : i32
    return %c0_i32, %c0_i32_0 : i32, i32
  }
  func.func @transform_2(%arg0: i32, %arg1: i32) -> (i32, i32) {
    %c0_i32 = arith.constant 0 : i32
    %c0_i32_0 = arith.constant 0 : i32
    %c0_i32_1 = arith.constant 0 : i32
    return %c0_i32, %c0_i32_0 : i32, i32
  }
  func.func @transform_3(%arg0: i32, %arg1: i32) -> (i32, i32) {
    %c0_i32 = arith.constant 0 : i32
    %c0_i32_0 = arith.constant 0 : i32
    return %c0_i32, %arg0 : i32, i32
  }
  func.func @transform_4(%arg0: i32, %arg1: i32) -> (i32, i32) {
    %c0_i32 = arith.constant 0 : i32
    %c0_i32_0 = arith.constant 0 : i32
    return %c0_i32, %arg0 : i32, i32
  }
  func.func @transform_5(%arg0: i32, %arg1: i32) -> (i32, i32) {
    %c0_i32 = arith.constant 0 : i32
    return %arg1, %arg0 : i32, i32
  }
}

</mosaic_0001>

<bundles_post_ra>
// kernel: variational_decoder.1
= control target key start
LH: loop header
LB: loop body
LE: loop exit
PB: predicated region body
PF: predicated region fallthrough
CT: control target
= control target key end

     0   :  { %10 = vsyncpa [#allocation3], 0  ;;  %s1327_s0 = inlined_call_operand.vmem [shape: bf16[16,8], index: 0, kind: input, shape index: {}]   ;;  %s1328_s1 = inlined_call_operand.vmem [shape: bf16[8,128], index: 1, kind: input, shape index: {}]   ;;  %s1329_s2 = inlined_call_operand.vmem [shape: f32[1,128], index: 2, kind: input, shape index: {}]   ;;  %s1330_s3 = inlined_call_operand.hbm [shape: bf16[128,1024], index: 3, kind: input, shape index: {}]   ;;  %s1331_s4 = inlined_call_operand.vmem [shape: f32[1,1024], index: 4, kind: input, shape index: {}]   ;;  %s1332_s5 = inlined_call_operand.hbm [shape: f32[16,1024], index: 5, kind: output, shape index: {}]  }
   0x1   :  { %12 = vsyncpa [#allocation3 + $0x1], 0 }
   0x2   :  { %13 = vsyncpa [#allocation4], 0 }
   0x3   :  { %15 = vsyncpa [#allocation4 + $0x1], 0  ;;  %s1135_s18 = smov 0   ;;  %s1137_s19 = smov 0  }
   0x4   :  { %s1139_s20 = smov 0   ;;  %s1141_s21 = smov 0  }
   0x5   :  { %s1143_s22 = smov 0   ;;  %s1145_s23 = smov 0  }
   0x6 LB: > { %s802_s24 = sadd.s32 4294967295, %s1092_s23   ;;  %s803_s25 = sadd.s32 4294967294, %s1092_s23   ;;  %s1092_s23 = sphi %s1145_s23, %s21_s23   ;;  %s1088_s22 = sphi %s1143_s22, %s1343_s22   ;;  %s1084_s21 = sphi %s1141_s21, %s1342_s21   ;;  %s1080_s20 = sphi %s1139_s20, %s1341_s20   ;;  %s1076_s19 = sphi %s1137_s19, %s1340_s19   ;;  %s1072_s18 = sphi %s1135_s18, %s1339_s18  }
   0x7   : > { %s33_s26 = sadd.s32 1, %s1088_s22  ;;  %s108_s27 = sadd.s32 1, %s1080_s20 }
   0x8   : > { %p35_p0 = scmp.ge.s32.totalorder %s33_s26, 2  ;;  %p115_p1 = scmp.ne.s32.totalorder %s1080_s20, %s1076_s19 }
   0x9   : > { %p116_p2 = scmp.eq.s32.totalorder %s1092_s23, 0  ;;  %p121_p3 = scmp.ne.s32.totalorder %s1076_s19, %s1072_s18 }
   0xa   : > { %s1345_s26 = smov (%p35_p0, %s33_s26), 0  ;;  %p122_p5 = scmp.eq.s32.totalorder %s802_s24, 0 }
   0xb   : > { %p1176_p4 = por %p116_p2, %p115_p1  ;;  %s105_s29 = ssub.s32 %s1088_s22, %s1345_s26 }
   0xc   : > { %p173_p6 = scmp.eq.s32.totalorder %s802_s24, 1  ;;  %p106_p7 = scmp.eq.s32.totalorder %s105_s29, 0 }
   0xd   : > { %p1182_p8 = por %p122_p5, %p121_p3  ;;  %p179_p10 = scmp.eq.s32.totalorder %s803_s25, 1 }
   0xe   : > { %p1186_p9 = por %p173_p6, %p115_p1  ;;  %p876_p13 = scmp.lt.s32.totalorder %s1092_s23, 2 }
   0xf   : > { %s1191_s7 = scalar_select %p106_p7, %s1080_s20, %s108_s27  }
  0x10   : > { %p1193_p11 = por %p179_p10, %p121_p3  ;;  %s214_s9 = sand.u32 1, %s1080_s20  }
  0x11   : > { %s807_s10 = sshll.u32 %s214_s9, 8  ;;  %s854_s11 = sshll.u32 %s1088_s22, 8 }
  0x12   : > { %s224_s14 = scalar_lea.hbm %s1330_s3, %s854_s11  ;;  %s218_s15 = scalar_lea.vmem [#allocation2], %s807_s10 }
  0x13   : > { %s225_s16 = sshll.u32 %s218_s15, 4  ;;  %p1206_p0 = pnand %p876_p13, %p1176_p4  ;;  %s226_s16 = int_to_ptr.vmem [resolvable:$true] %s225_s16 }
  0x14   : > { %s215_s24 = scalar_lea.sflag [#allocation3], %s214_s9  ;;  %s997_s25 = scalar_lea.vmem %s226_s16, 4096 }
  0x15   : > { %p986_p1 = pneg %p1206_p0  ;;  %p998_p2 = scmp.ne.s32.totalorder %s226_s16, %s997_s25 }
  0x16   : > { %s1094_s27 = smov [#allocation2]  }
  0x17   : > { %p1000_p3 = pnand %p998_p2, %p986_p1  ;;  %s1002_s29 = sshll.u32 %s1094_s27, 4  ;;  %s1003_s29 = int_to_ptr.vmem [resolvable:$false] %s1002_s29 }
  0x18   : > { %s1004_s11 = scalar_lea.vmem %s1003_s29, 8192  ;;  %p1005_p6 = scmp.lt.s32.totalorder %s226_s16, %s1003_s29 }
  0x19   : > { %p1001_p5 = pneg %p1000_p3  ;;  %p1006_p7 = scmp.lt.s32.totalorder %s1004_s11, %s997_s25 }
  0x1b   : > { %p1007_p10 = por %p1006_p7, %p1005_p6 }
  0x1d   : > { %p1008_p12 = pnand %p1007_p10, %p1001_p5 }
  0x1f   : > { %1011 = shalt.err (!%p1008_p12)
}
  0x20   : > { %s1095_s28 = smov 512   ;;  %s1096_s9 = smov 256  }
  0x21   : > { %s1097_s10 = smov 16   ;;  %p810_p4 = scmp.ge.s32.totalorder %s1092_s23, 1 }
  0x22   : > { %871 = dma.hbm_to_vmem [thread:$0]  (!%p1206_p0), %s224_s14, 4096, %s226_s16, %s215_s24, %s1095_s28, %s1096_s9, %s1097_s10  }
  0x23   : > { %p241_p13 = scmp.lt.s32.totalorder %s1092_s23, 3 }
  0x25   : > { %p242_p1 = pnand %p810_p4, %p241_p13 }
  0x26   : > { %s1217_s12 = sand.u32 (!%p242_p1), 1, %s1076_s19  }
  0x27   : > { %245 = sbr.rel (%p242_p1) target bundleno = 469 (0x1d5), region = 40  ;;  %s811_s13 = sshll.u32 (!%p242_p1), %s1217_s12, 8 }
  0x28   : > { %s248_s15 = scalar_lea.sflag (!%p242_p1), [#allocation3], %s1217_s12  ;;  %s1221_s25 = scalar_lea.vmem (!%p242_p1), [#allocation2], %s811_s13 }
  0x2c   : > { %1063 = dma.done.wait (%p1182_p8), %s248_s15, 4096  }
  0x2d   : > { %1065 = vsyncadd (%p1182_p8), %s248_s15, 4294963200  ;;  %v1098_v0 = vmov 0.0   ;;  %vm1099_vm0 = vmmov 0   ;;  %vm321_vm1 = vcmask 1043456   ;;  %v304_v1 = vld [vmem:[%s1328_s1] sm:$0xf]  ;;  %v403_v47 = vlaneseq }
  0x2e   : > { %858 = vmatprep.subr.bf16.mxu0 %v1098_v0  ;;  %860 = vmatprep.mubr.msk.bf16.mxu0 %vm1099_vm0, %v1098_v0  ;;  %v323_v2 = vsel %vm321_vm1, %v304_v1, 0  ;;  %v935_v3 = vld [vmem:[%s1327_s0] sm:$0xff]   ;;  %vm317_vm2 = vcmask 64512   ;;  %v938_v5 = vld [vmem:[%s1221_s25 + $0xe8] ss:$16 sps:$4 sm:$0xff]   ;;  %v1100_v36 = vmov 0  }
  0x2f   : > { %859 = vmatpush3.bf16.msra.mxu0 %v323_v2  ;;  %v936_v4 = vld [vmem:[%s1221_s25 + $0xe4] ss:$16 sps:$4 sm:$0xff]   ;;  %v940_v6 = vld [vmem:[%s1221_s25 + $0xec] ss:$16 sps:$4 sm:$0xff]   ;;  %v941_v7 = vld [vmem:[%s1221_s25 + $0xe0] ss:$16 sps:$4 sm:$0xff]   ;;  %615 = vmatprep.mubr.bf16.mxu1 %v1100_v36 }
  0x30   : > { %583 = vmatprep.subr.bf16.mxu1 %v936_v4  ;;  %v942_v8 = vld [vmem:[%s1221_s25 + $0xc4] ss:$16 sps:$4 sm:$0xff]   ;;  %626 = vmatprep.subr.bf16.mxu0 %v940_v6  ;;  %v944_v9 = vld [vmem:[%s1221_s25 + $0xc8] ss:$16 sps:$4 sm:$0xff]   ;;  %v946_v10 = vld [vmem:[%s1221_s25 + $0xcc] ss:$16 sps:$4 sm:$0xff]  }
  0x31   : > { %584 = vmatpush1.bf16.msra.mxu1 %v941_v7  ;;  %v947_v11 = vld [vmem:[%s1221_s25 + $0xc0] ss:$16 sps:$4 sm:$0xff]   ;;  %v948_v12 = vld [vmem:[%s1221_s25 + $0xa4] ss:$16 sps:$4 sm:$0xff]   ;;  %v952_v13 = vld [vmem:[%s1221_s25 + $0xac] ss:$16 sps:$4 sm:$0xff]  }
  0x32   : > { %861 = vmatmul.mubr.msk.bf16.vlgmr.msra.gmra.mxu0 %vm317_vm2, %v935_v3  ;;  %585 = vmatprep.subr.bf16.mxu1 %v942_v8  ;;  %v950_v14 = vld [vmem:[%s1221_s25 + $0xa8] ss:$16 sps:$4 sm:$0xff]   ;;  %v953_v15 = vld [vmem:[%s1221_s25 + $0xa0] ss:$16 sps:$4 sm:$0xff]   ;;  %v954_v16 = vld [vmem:[%s1221_s25 + $0x84] ss:$16 sps:$4 sm:$0xff]  }
  0x33   : > { %627 = vmatpush1.bf16.msra.mxu0 %v938_v5  ;;  %v958_v17 = vld [vmem:[%s1221_s25 + $0x8c] ss:$16 sps:$4 sm:$0xff]   ;;  %v956_v18 = vld [vmem:[%s1221_s25 + $0x88] ss:$16 sps:$4 sm:$0xff]   ;;  %v959_v19 = vld [vmem:[%s1221_s25 + $0x80] ss:$16 sps:$4 sm:$0xff]   ;;  %658 = vmatprep.mubr.bf16.mxu0 %v1100_v36 }
  0x34   : > { %628 = vmatprep.subr.bf16.mxu0 %v946_v10  ;;  %v960_v20 = vld [vmem:[%s1221_s25 + $0x64] ss:$16 sps:$4 sm:$0xff]   ;;  %v964_v21 = vld [vmem:[%s1221_s25 + $0x6c] ss:$16 sps:$4 sm:$0xff]   ;;  %v962_v22 = vld [vmem:[%s1221_s25 + $0x68] ss:$16 sps:$4 sm:$0xff]  }
  0x35   : > { %586 = vmatpush1.bf16.msra.mxu1 %v947_v11  ;;  %v965_v23 = vld [vmem:[%s1221_s25 + $0x60] ss:$16 sps:$4 sm:$0xff]   ;;  %v966_v24 = vld [vmem:[%s1221_s25 + $0x44] ss:$16 sps:$4 sm:$0xff]   ;;  %v970_v25 = vld [vmem:[%s1221_s25 + $0x4c] ss:$16 sps:$4 sm:$0xff]  }
  0x36   : > { %587 = vmatprep.subr.bf16.mxu1 %v948_v12  ;;  %v968_v26 = vld [vmem:[%s1221_s25 + $0x48] ss:$16 sps:$4 sm:$0xff]   ;;  %v971_v27 = vld [vmem:[%s1221_s25 + $0x40] ss:$16 sps:$4 sm:$0xff]   ;;  %v972_v28 = vld [vmem:[%s1221_s25 + $0x24] ss:$16 sps:$4 sm:$0xff]  }
  0x37   : > { %629 = vmatpush1.bf16.msra.mxu0 %v944_v9  ;;  %v976_v29 = vld [vmem:[%s1221_s25 + $0x2c] ss:$16 sps:$4 sm:$0xff]   ;;  %v974_v30 = vld [vmem:[%s1221_s25 + $0x28] ss:$16 sps:$4 sm:$0xff]   ;;  %v977_v31 = vld [vmem:[%s1221_s25 + $0x20] ss:$16 sps:$4 sm:$0xff]  }
  0x38   : > { %630 = vmatprep.subr.bf16.mxu0 %v952_v13  ;;  %v978_v32 = vld [vmem:[%s1221_s25 + $0x4] ss:$16 sps:$4 sm:$0xff]   ;;  %v982_v33 = vld [vmem:[%s1221_s25 + $0xc] ss:$16 sps:$4 sm:$0xff]   ;;  %v980_v34 = vld [vmem:[%s1221_s25 + $0x8] ss:$16 sps:$4 sm:$0xff]  }
  0x39   : > { %588 = vmatpush1.bf16.msra.mxu1 %v953_v15  ;;  %v983_v35 = vld [vmem:[%s1221_s25] ss:$16 sps:$4 sm:$0xff]   ;;  %s813_s29 = sshll.u32 %s1084_s21, 2  ;;  %v404_v48 = vshrl.u32 %v403_v47, 7  ;;  %s812_s10 = sshll.u32 %s1217_s12, 6 }
  0x3a   : > { %589 = vmatprep.subr.bf16.mxu1 %v954_v16  ;;  %v814_v37 = vld [vmem:[%s1329_s2] ss:$0 sm:$0xff]  ;;  %p295_p8 = scmp.lt.s32.totalorder %s813_s29, 7  ;;  %s286_s13 = scalar_lea.vmem [#allocation5], %s812_s10 }
  0x3b   : > { %631 = vmatpush1.bf16.msra.mxu0 %v950_v14  ;;  %v405_v49 = vsub.s32 0, %v404_v48  ;;  %v413_v50 = vsub.s32 2, %v404_v48  ;;  %v409_v52 = vsub.s32 1, %v404_v48  ;;  %v417_v53 = vsub.s32 3, %v404_v48  ;;  %s694_s15 = sshll.u32 %s286_s13, 4  ;;  %s855_s25 = sshll.u32 %s1084_s21, 9  ;;  %s1274_s15 = int_to_ptr.vmem [resolvable:$true] %s694_s15 }
  0x3c   : > { %632 = vmatprep.subr.bf16.mxu0 %v958_v17  ;;  %s1347_s29 = smov (!%p295_p8, %s813_s29), 7  ;;  %s1279_s17 = scalar_lea.hbm %s1332_s5, %s855_s25 }
  0x3d   : > { %590 = vmatpush1.bf16.msra.mxu1 %v959_v19  ;;  %s297_s9 = scalar_lea.vmem %s1331_s4, %s1347_s29  ;;  %s678_s21 = scalar_lea.sflag [#allocation4], %s1217_s12 }
  0x3e   : > { %591 = vmatprep.subr.bf16.mxu1 %v960_v20  ;;  %v401_v51 = vld [vmem:[%s297_s9] sm:$0xf]  ;;  %s1012_s30 = scalar_lea.vmem %s1274_s15, 1024  ;;  %s1101_s24 = smov [#allocation5]  }
  0x3f   : > { %633 = vmatpush1.bf16.msra.mxu0 %v956_v18  ;;  %v406_v54 = vrot.slane %v401_v51, %v405_v49  ;;  %v414_v55 = vrot.slane %v401_v51, %v413_v50  ;;  %v410_v56 = vrot.slane %v401_v51, %v409_v52  ;;  %v418_v57 = vrot.slane %v401_v51, %v417_v53  ;;  %p1013_p12 = scmp.ne.s32.totalorder %s1274_s15, %s1012_s30  ;;  %s1016_s27 = sshll.u32 %s1101_s24, 4  ;;  %s1017_s27 = int_to_ptr.vmem [resolvable:$false] %s1016_s27 }
  0x40   : > { %634 = vmatprep.subr.bf16.mxu0 %v964_v21  ;;  %s1018_s29 = scalar_lea.vmem %s1017_s27, 2048  ;;  %p1019_p3 = scmp.lt.s32.totalorder %s1274_s15, %s1017_s27 }
  0x41   : > { %592 = vmatpush1.bf16.msra.mxu1 %v965_v23  ;;  %p1014_p0 = pnand %p1013_p12, %p1186_p9  ;;  %p1020_p5 = scmp.lt.s32.totalorder %s1018_s29, %s1012_s30 }
  0x42   : > { %593 = vmatprep.subr.bf16.mxu1 %v966_v24 }
  0x43   : > { %635 = vmatpush1.bf16.msra.mxu0 %v962_v22  ;;  %p1015_p2 = pneg %p1014_p0  ;;  %p1021_p6 = por %p1020_p5, %p1019_p3 }
  0x44   : > { %636 = vmatprep.subr.bf16.mxu0 %v970_v25 }
  0x45   : > { %594 = vmatpush1.bf16.msra.mxu1 %v971_v27  ;;  %p1022_p7 = pnand %p1021_p6, %p1015_p2 }
  0x46   : > { %595 = vmatprep.subr.bf16.mxu1 %v972_v28 }
  0x47   : > { %637 = vmatpush1.bf16.msra.mxu0 %v968_v26 }
  0x48   : > { %638 = vmatprep.subr.bf16.mxu0 %v976_v29 }
  0x49   : > { %596 = vmatpush1.bf16.msra.mxu1 %v977_v31 }
  0x4a   : > { %597 = vmatprep.subr.bf16.mxu1 %v978_v32 }
  0x4b   : > { %639 = vmatpush1.bf16.msra.mxu0 %v974_v30 }
  0x4c   : > { %640 = vmatprep.subr.bf16.mxu0 %v982_v33 }
  0x4d   : > { %598 = vmatpush1.bf16.msra.mxu1 %v983_v35 }
  0x4f   : > { %641 = vmatpush1.bf16.msra.mxu0 %v980_v34 }
  0xf2   : > { %v359_v38 = vpop.f32.mrf.mxu0 }
  0xf3   : > { %v360_v40 = vadd.f32 %v814_v37, %v359_v38 }
  0xf4   : > { %v862_v39 = vpop.f32.mrf.mxu0 }
  0xf5   : > { %v366_v44 = vmax.f32 %v360_v40, 0.0 }
  0xf6   : > { %v362_v41 = vpop.f32.mrf.mxu0 }
  0xf7   : > { %v363_v42 = vadd.f32 %v814_v37, %v362_v41 }
  0xf8   : > { %v863_v43 = vpop.f32.mrf.mxu0 }
  0xf9   : > { %v367_v45 = vmax.f32 %v363_v42, 0.0 }
  0xfb   : > { %v368_v46 = vpack.c.bf16 %v367_v45, %v366_v44 }
  0xfd   : > { %616 = vmatmul.mubr.bf16.vlgmr.msra.gmra.mxu1 %v368_v46  ;;  %659 = vmatmul.mubr.bf16.vlgmr.msra.gmra.mxu0 %v368_v46 }
 0x1bd   : > { %v617_v58 = vpop.f32.mrf.mxu1  ;;  %v660_v59 = vpop.f32.mrf.mxu0 }
 0x1be   : > { %v618_v60 = vadd.f32 %v617_v58, %v406_v54  ;;  %v661_v61 = vadd.f32 %v660_v59, %v414_v55 }
 0x1bf   : > { %v619_v62 = vpop.f32.mrf.mxu1  ;;  %v662_v63 = vpop.f32.mrf.mxu0 }
 0x1c0   : > { %669 = vst [vmem:[%s286_s13] sm:$0xff] %v618_v60  ;;  %671 = vst [vmem:[%s286_s13 + $0x10] sm:$0xff] %v661_v61  ;;  %v620_v0 = vadd.f32 %v619_v62, %v410_v56  ;;  %v663_v1 = vadd.f32 %v662_v63, %v418_v57 }
 0x1c1   : > { %v621_v2 = vpop.f32.mrf.mxu1  ;;  %v664_v3 = vpop.f32.mrf.mxu0 }
 0x1c2   : > { %670 = vst [vmem:[%s286_s13 + $0x8] sm:$0xff] %v620_v0  ;;  %672 = vst [vmem:[%s286_s13 + $0x18] sm:$0xff] %v663_v1  ;;  %v622_v4 = vadd.f32 %v621_v2, %v406_v54  ;;  %v665_v5 = vadd.f32 %v664_v3, %v414_v55 }
 0x1c3   : > { %v623_v6 = vpop.f32.mrf.mxu1  ;;  %v666_v7 = vpop.f32.mrf.mxu0 }
 0x1c4   : > { %673 = vst [vmem:[%s286_s13 + $0x20] sm:$0xff] %v622_v4  ;;  %675 = vst [vmem:[%s286_s13 + $0x30] sm:$0xff] %v665_v5  ;;  %v624_v8 = vadd.f32 %v623_v6, %v410_v56  ;;  %v667_v9 = vadd.f32 %v666_v7, %v418_v57 }
 0x1c6   : > { %674 = vst [vmem:[%s286_s13 + $0x28] sm:$0xff] %v624_v8  ;;  %676 = vst [vmem:[%s286_s13 + $0x38] sm:$0xff] %v667_v9 }
 0x1c7   : > { %1025 = shalt.err (!%p1022_p7)
}
 0x1c8   : > { %s1026_s11 = scalar_lea.hbm %s1279_s17, 1024  ;;  %s1030_s10 = scalar_lea.hbm %s1332_s5, 2048 }
 0x1c9   : > { %p1027_p10 = scmp.ne.s32.totalorder %s1279_s17, %s1026_s11  ;;  %p1031_p1 = scmp.lt.s32.totalorder %s1279_s17, %s1332_s5 }
 0x1ca   : > { %p1032_p8 = scmp.lt.s32.totalorder %s1030_s10, %s1026_s11 }
 0x1cb   : > { %p1028_p4 = pnand %p1027_p10, %p1186_p9 }
 0x1cc   : > { %p1033_p12 = por %p1032_p8, %p1031_p1 }
 0x1cd   : > { %p1029_p13 = pneg %p1028_p4 }
 0x1cf   : > { %p1034_p0 = pnand %p1033_p12, %p1029_p13 }
 0x1d1   : > { %1037 = shalt.err (!%p1034_p0)
}
 0x1d2   : > { %s1102_s14 = smov 512   ;;  %s1103_s16 = smov 1024  }
 0x1d3   : > { %s1104_s30 = smov 32  }
 0x1d4   : > { %866 = dma.vmem_to_hbm [thread:$0]  (%p1186_p9), %s1274_s15, 1024, %s1279_s17, %s678_s21, %s1102_s14, %s1103_s16, %s1104_s30  }
 0x1d5 PF: > { %s709_s24 = sand.u32 1, %s1072_s18   ;;  %p1338_p2 = scmp.ge.s32.totalorder %s1092_s23, 2 }
 0x1d6   : > { %s710_s27 = scalar_lea.sflag [#allocation4], %s709_s24 }
 0x1d7   : > { %p873_p3 = pnand %p1338_p2, %p1193_p11 }
 0x1d9   : > { %p874_p5 = pneg %p873_p3 }
 0x1db   : > { %1067 = dma.done.wait (%p874_p5), %s710_s27, 1024  }
 0x1dc   : > { %1069 = vsyncadd (%p874_p5), %s710_s27, 4294966272  ;;  %s21_s23 = sadd.s32 1, %s1092_s23   ;;  %s1339_s18 = smov %s1076_s19 }
 0x1dd   : > { %p18_p6 = scmp.ge.s32.totalorder %s21_s23, 4   ;;  %s1340_s19 = smov %s1080_s20 }
 0x1de   : > { %s1341_s20 = smov %s1191_s7  ;;  %s1342_s21 = smov %s1088_s22 }
 0x1df   : > { %s1343_s22 = smov %s1345_s26  ;;  %20 = sbr.rel (!%p18_p6) target bundleno = 6 (0x6), region = 91 }
 0x1e4   :  { %715 = vsyncpa [#allocation3], 1 }
 0x1e5   :  { %717 = vsyncpa [#allocation3 + $0x1], 1 }
 0x1e6   :  { %718 = vsyncpa [#allocation4], 1 }
 0x1e7   :  { %720 = vsyncpa [#allocation4 + $0x1], 1 }

</bundles_post_ra>
